<compile_context>
chip_gen: v7x
topology: tpu7x:2x2x1
jax: 0.10.0
libtpu: 0.0.40
codegen_flags: <defaults>
</compile_context>

<pallas_src>
import functools

import numpy as np

import jax
import jax.numpy as jnp
from jax.experimental import pallas as pl
from jax.experimental.pallas import tpu as pltpu

EPS = 1e-5  # PyTorch BatchNorm2d default eps

# pltpu.roll is expected to follow jnp.roll semantics (roll(x, s)[i] == x[(i - s) % n]).
# A tiny runtime probe pins the rotation direction so the spatial-shift sign can never
# silently flip across jax versions.
_ROLL_LIKE_JNP = True


def _calibrate_roll():
    global _ROLL_LIKE_JNP

    def kernel(x_ref, o_ref):
        o_ref[...] = pltpu.roll(x_ref[...], 1, axis=1)

    x = jnp.arange(128, dtype=jnp.int32).reshape(1, 128)
    r = pl.pallas_call(
        kernel, out_shape=jax.ShapeDtypeStruct((1, 128), jnp.int32))(x)
    _ROLL_LIKE_JNP = int(r[0, 0]) == 127  # jnp.roll([0..127], 1)[0] == 127


def _lane_shift(x, s):
    """y[:, p] = x[:, (p + s) % M]  (lane rotation; wrapped lanes are masked by caller)."""
    m = x.shape[-1]
    s = s % m
    if s == 0:
        return x
    shift = (-s) % m if _ROLL_LIKE_JNP else s
    return pltpu.roll(x, shift, axis=1)


# ----------------------------------------------------------------------------
# In-kernel fused conv + folded-BN + ReLU over a (C, M) slab
# ----------------------------------------------------------------------------
def _conv_taps(x_b16, w_ref, b_ref, m_ref, taps, img_w):
    """relu( sum_t W_t @ shift(x, dy_t*img_w + dx_t) * mask_t + bias ), f32 (Cout, M).

    x_b16 : (Cin, M) bf16 activation slab (M = N*H*W on lanes).
    w_ref : (T, Cout, Cin) bf16 per-tap weights, BN scale folded in.
    b_ref : (Cout, 1) f32 folded conv+BN bias.
    m_ref : (T, M) f32 {0,1} boundary masks (one row per tap).
    """
    acc = None
    for t, (dy, dx) in enumerate(taps):
        xs = _lane_shift(x_b16, dy * img_w + dx)
        c = jnp.dot(w_ref[t], xs, preferred_element_type=jnp.float32)
        if dy != 0 or dx != 0:
            c = c * m_ref[t:t + 1, :]
        acc = c if acc is None else acc + c
    return jnp.maximum(acc + b_ref[...], 0.0)


def _conv_bn_relu_kernel(img_w, taps, x_ref, w_ref, b_ref, m_ref, o_ref):
    out = _conv_taps(x_ref[...], w_ref, b_ref, m_ref, taps, img_w)
    o_ref[...] = out.astype(o_ref.dtype)


def _inception_middle_kernel(img_w, branch_taps, a_ref, *refs):
    """Five asym (k,1)->(1,k) conv+BN+ReLU branches, channel concat, 1x1 conv_2_output
    (BN+ReLU) and the residual add (out1 + conv_1), fused into one kernel."""
    nb = len(branch_taps)
    o_ref = refs[-1]
    wo_ref = refs[6 * nb]
    bo_ref = refs[6 * nb + 1]
    a = a_ref[...]                       # (C, M) bf16 conv_1 activation (also residual)
    acc = None
    for i, (taps_y, taps_x) in enumerate(branch_taps):
        wy, by, my, wx, bx, mx = refs[6 * i: 6 * i + 6]
        h = _conv_taps(a, wy, by, my, taps_y, img_w).astype(jnp.bfloat16)
        g = _conv_taps(h, wx, bx, mx, taps_x, img_w).astype(jnp.bfloat16)
        # 1x1 conv_2_output applied to this branch's slice of the channel concat.
        c = jnp.dot(wo_ref[i], g, preferred_element_type=jnp.float32)
        acc = c if acc is None else acc + c
    out1 = jnp.maximum(acc + bo_ref[...], 0.0)
    o_ref[...] = (out1 + a.astype(jnp.float32)).astype(o_ref.dtype)


# ----------------------------------------------------------------------------
# Wrapper glue: fold BN into weights, build tap offsets/masks, launch kernels
# ----------------------------------------------------------------------------
def _fold_conv_bn(p):
    """Fold BN(eval) scale into the conv weight; return ((T,Cout,Cin) bf16, (Cout,1) f32)."""
    w, b, gamma, beta, mean, var = p
    cout, cin, kh, kw = w.shape
    scale = gamma / jnp.sqrt(var + EPS)
    bias = (beta + (b - mean) * scale).reshape(cout, 1).astype(jnp.float32)
    w_taps = jnp.transpose(w, (2, 3, 0, 1)).reshape(kh * kw, cout, cin)
    w_taps = (w_taps * scale[None, :, None]).astype(jnp.bfloat16)
    return w_taps, bias


def _tap_masks(taps, n, h, w):
    """(T, N*H*W) f32 {0,1} masks: 1 where the tap's shifted read stays inside the image."""
    yy, xx = np.meshgrid(np.arange(h), np.arange(w), indexing="ij")
    rows = []
    for dy, dx in taps:
        ok = (yy + dy >= 0) & (yy + dy < h) & (xx + dx >= 0) & (xx + dx < w)
        rows.append(np.tile(ok.reshape(-1), n))
    return jnp.asarray(np.stack(rows).astype(np.float32))


def conv_bn_relu(x_cm, p, kh, kw, ph, pw, dh, dw, n, h, w, out_dtype=jnp.bfloat16):
    """Conv2d(kernel=(kh,kw), pad=(ph,pw), dil=(dh,dw), stride=1) + BatchNorm2d(eval)
    + ReLU, on a channels-major (Cin, N*H*W) slab."""
    w_taps, bias = _fold_conv_bn(p)
    taps = tuple((ky * dh - ph, kx * dw - pw) for ky in range(kh) for kx in range(kw))
    masks = _tap_masks(taps, n, h, w)
    cout = w_taps.shape[1]
    m = x_cm.shape[1]
    kernel = functools.partial(_conv_bn_relu_kernel, w, taps)
    return pl.pallas_call(
        kernel,
        out_shape=jax.ShapeDtypeStruct((cout, m), out_dtype),
    )(x_cm.astype(jnp.bfloat16), w_taps, bias, masks)


_BRANCH_CFG = (("conv_2_1", 1, 0, 1),
               ("conv_2_2", 3, 1, 1),
               ("conv_2_3", 5, 2, 1),
               ("conv_2_4", 3, 2, 2),
               ("conv_2_5", 3, 4, 4))


def inception_middle(a_cm, params, n, h, w):
    """All five inception branches + concat + conv_2_output + residual, one pallas_call."""
    c, m = a_cm.shape
    args, branch_taps = [], []
    for name, k, p, d in _BRANCH_CFG:
        pa, pb = params[name]
        wy, by = _fold_conv_bn(pa)                       # (k,1) conv, pad (p,0), dil (d,1)
        wx, bx = _fold_conv_bn(pb)                       # (1,k) conv, pad (0,p), dil (1,d)
        taps_y = tuple((i * d - p, 0) for i in range(k))
        taps_x = tuple((0, j * d - p) for j in range(k))
        branch_taps.append((taps_y, taps_x))
        args += [wy, by, _tap_masks(taps_y, n, h, w),
                 wx, bx, _tap_masks(taps_x, n, h, w)]
    wo, bo, go, beo, mo, vo = params["conv_2_output"]
    so = go / jnp.sqrt(vo + EPS)
    bias_o = (beo + (bo - mo) * so).reshape(c, 1).astype(jnp.float32)
    # (Cout, 5*C, 1, 1) -> per-branch (5, Cout, C) slices matching torch.cat order.
    wo_s = (wo[:, :, 0, 0] * so[:, None]).reshape(c, len(_BRANCH_CFG), c)
    wo_s = jnp.transpose(wo_s, (1, 0, 2)).astype(jnp.bfloat16)
    args += [wo_s, bias_o]
    kernel = functools.partial(_inception_middle_kernel, w, tuple(branch_taps))
    return pl.pallas_call(
        kernel,
        out_shape=jax.ShapeDtypeStruct((c, m), jnp.bfloat16),
    )(a_cm, *args)


# ----------------------------------------------------------------------------
# Parameters (deterministic synthetic init; shapes follow the PyTorch module)
# ----------------------------------------------------------------------------
def init_conv_bn(key, cin, cout, kh, kw):
    k1, k2, k3, k4, k5, k6 = jax.random.split(key, 6)
    w = jax.random.normal(k1, (cout, cin, kh, kw), jnp.float32) * 0.1
    b = jax.random.normal(k2, (cout,), jnp.float32) * 0.05
    gamma = jax.random.uniform(k3, (cout,), jnp.float32, 0.5, 1.5)
    beta = jax.random.normal(k4, (cout,), jnp.float32) * 0.05
    mean = jax.random.normal(k5, (cout,), jnp.float32) * 0.05
    var = jax.random.uniform(k6, (cout,), jnp.float32, 0.5, 1.5)
    return (w, b, gamma, beta, mean, var)


def init_asym_block(key, dim, k):
    ka, kb = jax.random.split(key)
    return (init_conv_bn(ka, dim, dim, k, 1),   # (k,1) conv + BN + ReLU
            init_conv_bn(kb, dim, dim, 1, k))   # (1,k) conv + BN + ReLU


def init_params(key, in_dim, out_dim):
    ks = jax.random.split(key, 8)
    return {
        "conv_1":        init_conv_bn(ks[0], in_dim, out_dim, 3, 3),
        "conv_2_1":      init_asym_block(ks[1], out_dim, 1),
        "conv_2_2":      init_asym_block(ks[2], out_dim, 3),
        "conv_2_3":      init_asym_block(ks[3], out_dim, 5),
        "conv_2_4":      init_asym_block(ks[4], out_dim, 3),
        "conv_2_5":      init_asym_block(ks[5], out_dim, 3),
        "conv_2_output": init_conv_bn(ks[6], out_dim * 5, out_dim, 1, 1),
        "conv_3":        init_conv_bn(ks[7], out_dim, out_dim, 3, 3),
    }


# ----------------------------------------------------------------------------
# Forward pass (mirrors the PyTorch module; NCHW in / NCHW out)
# ----------------------------------------------------------------------------
@jax.jit
def model_forward(x_nchw, params):
    n, cin, h, w = x_nchw.shape
    x_cm = jnp.transpose(x_nchw, (1, 0, 2, 3)).reshape(cin, n * h * w)
    conv_1 = conv_bn_relu(x_cm, params["conv_1"], 3, 3, 1, 1, 1, 1, n, h, w)
    mid = inception_middle(conv_1, params, n, h, w)              # = out1 + conv_1
    conv_3 = conv_bn_relu(mid, params["conv_3"], 3, 3, 1, 1, 1, 1, n, h, w,
                          out_dtype=jnp.float32)
    cout = conv_3.shape[0]
    return jnp.transpose(conv_3.reshape(cout, n, h, w), (1, 0, 2, 3))


# ----------------------------------------------------------------------------
if __name__ == "__main__":
    _calibrate_roll()

    key = jax.random.PRNGKey(0)
    kx, kp = jax.random.split(key)

    n, in_dim, out_dim, h, w = 2, 4, 8, 16, 16
    x = jax.random.normal(kx, (n, in_dim, h, w), jnp.float32)
    params = init_params(kp, in_dim, out_dim)

    out = model_forward(x, params)
    jax.block_until_ready(out)
    assert out.shape == (n, out_dim, h, w), out.shape
    assert bool(jnp.all(jnp.isfinite(out)))
    print("KERNEL_OK")
</pallas_src>

<mosaic_0001>
module attributes {stable_mosaic.version = 11 : i64} {
  func.func @kernel(%arg0: memref<1x128xi32, #tpu.memory_space<vmem>>, %arg1: memref<1x128xi32, #tpu.memory_space<vmem>>) attributes {dimension_semantics = [], scalar_prefetch = 0 : i64, scratch_operands = 0 : i64, tpu.core_type = #tpu.core_type<tc>} {
    %c0 = arith.constant 0 : index
    %c0_0 = arith.constant 0 : index
    %0 = vector.load %arg0[%c0, %c0_0] : memref<1x128xi32, #tpu.memory_space<vmem>>, vector<1x128xi32>
    %c1_i32 = arith.constant 1 : i32
    %1 = tpu.dynamic_rotate %0 by %c1_i32 dim 1 : vector<1x128xi32>, i32 -> vector<1x128xi32>
    %c0_1 = arith.constant 0 : index
    %c0_2 = arith.constant 0 : index
    %2 = vector.load %arg1[%c0_1, %c0_2] : memref<1x128xi32, #tpu.memory_space<vmem>>, vector<1x128xi32>
    tpu.vector_store %arg1[%c0_1, %c0_2], %1 {strides = array<i32>} : memref<1x128xi32, #tpu.memory_space<vmem>>, vector<1x128xi32>,
    return
  }
}

</mosaic_0001>

<bundles_post_ra>
// kernel: tpu_custom_call.1
= control target key start
LH: loop header
LB: loop body
LE: loop exit
PB: predicated region body
PF: predicated region fallthrough
CT: control target
= control target key end

     0   :  { %6 = vsyncpa [#allocation3], 0  ;;  %s128_s0 = inlined_call_operand.hbm [shape: s32[1,128], index: 0, kind: input, shape index: {}]   ;;  %s129_s1 = inlined_call_operand.hbm [shape: s32[1,128], index: 1, kind: output, shape index: {}]  }
   0x1   :  { %7 = vsyncpa [#allocation4], 0  ;;  %s91_s6 = smov [#allocation2]   ;;  %s43_s10 = scalar_lea.hbm %s128_s0, 16 }
   0x2   :  { %s14_s7 = sshll.u32 %s91_s6, 4  ;;  %p44_p0 = scmp.ne.s32.totalorder %s128_s0, %s43_s10  ;;  %s15_s7 = int_to_ptr.vmem [resolvable:$true] %s14_s7 }
   0x3   :  { %p47_p1 = scmp.lt.u32.totalorder %s43_s10, %s128_s0 }
   0x5   :  { %p49_p2 = pnand %p47_p1, %p44_p0 }
   0x7   :  { %52 = shalt.err (!%p49_p2)
}
   0x8   :  { %s53_s15 = scalar_lea.vmem %s15_s7, 16  ;;  %s57_s16 = scalar_lea.vmem %s15_s7, 32 }
   0x9   :  { %p54_p3 = scmp.ne.s32.totalorder %s15_s7, %s53_s15  ;;  %p58_p4 = scmp.lt.s32.totalorder %s15_s7, %s15_s7 }
   0xa   :  { %p59_p5 = scmp.lt.s32.totalorder %s57_s16, %s53_s15 }
   0xc   :  { %p60_p6 = por %p59_p5, %p58_p4 }
   0xe   :  { %p61_p7 = pnand %p60_p6, %p54_p3 }
  0x10   :  { %64 = shalt.err (!%p61_p7)
}
  0x11   :  { %17 = dma.hbm_to_vmem [thread:$0]  %s128_s0, 16, %s15_s7, [#allocation3]  }
  0x12   :  { %87 = dma.done.wait [#allocation3], 16  }
  0x13   :  { %88 = vsyncadd [#allocation3], 4294967280  ;;  %v21_v0 = vld [vmem:[#allocation2] sm:$0x1]  ;;  %s92_s19 = smov 1   ;;  %s93_s20 = smov [#allocation5]  }
  0x14   :  { %22 = vrot.lane.b32.xlu0 %v21_v0, %s92_s19  ;;  %s31_s21 = sshll.u32 %s93_s20, 4  ;;  %s32_s21 = int_to_ptr.vmem [resolvable:$true] %s31_s21 }
  0x15   :  { %s65_s22 = scalar_lea.vmem %s32_s21, 16  ;;  %s69_s23 = scalar_lea.vmem %s32_s21, 32 }
  0x16   :  { %p66_p8 = scmp.ne.s32.totalorder %s32_s21, %s65_s22  ;;  %p70_p9 = scmp.lt.s32.totalorder %s32_s21, %s32_s21 }
  0x17   :  { %p71_p10 = scmp.lt.s32.totalorder %s69_s23, %s65_s22 }
  0x19   :  { %p72_p11 = por %p71_p10, %p70_p9 }
  0x1b   :  { %p73_p12 = pnand %p72_p11, %p66_p8 }
  0x86   :  { %v23_v1 = vpop.permute.xlu0 %22 }
  0x87   :  { %24 = vst [vmem:[#allocation5] sm:$0x1] %v23_v1 }
  0x88   :  { %76 = shalt.err (!%p73_p12)
}
  0x89   :  { %s77_s25 = scalar_lea.hbm %s129_s1, 16 }
  0x8a   :  { %p78_p13 = scmp.ne.s32.totalorder %s129_s1, %s77_s25  ;;  %p81_p0 = scmp.lt.u32.totalorder %s77_s25, %s129_s1 }
  0x8c   :  { %p83_p1 = pnand %p81_p0, %p78_p13 }
  0x8e   :  { %86 = shalt.err (!%p83_p1)
}
  0x8f   :  { %34 = dma.vmem_to_hbm [thread:$0]  %s32_s21, 16, %s129_s1, [#allocation4]  }
  0x90   :  { %89 = dma.done.wait [#allocation4], 16  }
  0x91   :  { %90 = vsyncadd [#allocation4], 4294967280 }
  0x92   :  { %38 = vsyncpa [#allocation3], 1 }
  0x93   :  { %39 = vsyncpa [#allocation4], 1 }

</bundles_post_ra>
